<compile_context>
chip_gen: v5e
topology: v5e:2x2
jax: 0.10.0
libtpu: 0.0.40
codegen_flags: <defaults>
</compile_context>

<pallas_src>
import functools

import jax
import jax.numpy as jnp
from jax.experimental import pallas as pl
from jax.experimental.pallas import tpu as pltpu


def _round_up(x: int, m: int) -> int:
    return ((x + m - 1) // m) * m


def _residual_kernel(fn, n_params, *refs):
    """refs = (x_ref, *param_refs, o_ref); computes o = fn(x, *params) + x."""
    x_ref = refs[0]
    param_refs = refs[1:1 + n_params]
    o_ref = refs[1 + n_params]

    x = x_ref[...]
    params = tuple(p[...] for p in param_refs)
    y = fn(x, *params)
    # Residual add in f32; cast exactly once at the store (no double rounding).
    o_ref[...] = (y.astype(jnp.float32) + x.astype(jnp.float32)).astype(o_ref.dtype)


def residual_pallas(fn, x, params=(), *, row_tile=None):
    """Pallas implementation of Residual(fn): returns fn(x, *params) + x.

    `fn` must be a jnp-traceable function of (x_tile, *params) that is
    row-wise along the tiled (token) axis and preserves the tile shape.
    """
    orig_shape = x.shape
    d = orig_shape[-1]
    x2 = x.reshape(-1, d)                      # (rows, D); D on the lane axis
    rows = x2.shape[0]

    # --- Row tiling: large tiles amortize per-step overhead & feed the MXU. ---
    if row_tile is None:
        row_tile = 256
    row_tile = _round_up(max(int(row_tile), 8), 8)
    row_tile = min(row_tile, _round_up(rows, 8))
    padded_rows = _round_up(rows, row_tile)
    if padded_rows != rows:
        x2 = jnp.pad(x2, ((0, padded_rows - rows), (0, 0)))

    grid = (padded_rows // row_tile,)

    # --- Specs. x tiles over rows; params get full (constant-index) blocks. ---
    in_specs = [pl.BlockSpec((row_tile, d), lambda i: (i, 0))]
    call_params = []
    for p in params:
        p_arr = p.reshape(1, -1) if p.ndim == 1 else p   # TPU-friendly 2-D
        call_params.append(p_arr)
        # Bind the rank via a default arg (avoids the late-binding closure bug).
        in_specs.append(
            pl.BlockSpec(p_arr.shape, lambda i, _nd=p_arr.ndim: (0,) * _nd))

    # Advisory cost estimate so XLA schedules/overlaps around this kernel.
    try:
        cost = pl.estimate_cost(lambda xx, *ps: fn(xx, *ps) + xx, x2, *call_params)
    except Exception:  # estimation is purely advisory
        cost = None

    out = pl.pallas_call(
        functools.partial(_residual_kernel, fn, len(call_params)),
        out_shape=jax.ShapeDtypeStruct((padded_rows, d), x.dtype),
        grid_spec=pltpu.PrefetchScalarGridSpec(
            num_scalar_prefetch=0,
            grid=grid,
            in_specs=in_specs,
            out_specs=pl.BlockSpec((row_tile, d), lambda i: (i, 0)),
        ),
        compiler_params=pltpu.CompilerParams(
            dimension_semantics=("parallel",)),
        cost_estimate=cost,
    )(x2, *call_params)

    if padded_rows != rows:
        out = out[:rows]
    return out.reshape(orig_shape)


# ----------------------------------------------------------------------------
# Demo `fn`: a linear projection (the kind of sub-block Residual wraps in ViT).
# bf16 operands into the MXU, f32 accumulation; bias stays f32 — the residual
# add + single downcast happen in the kernel epilogue.
# ----------------------------------------------------------------------------
def linear_fn(x_tile, w, b):
    # x_tile: (row_tile, D), w: (D, D), b: (1, D)
    y = jnp.dot(x_tile.astype(jnp.bfloat16), w.astype(jnp.bfloat16),
                preferred_element_type=jnp.float32)
    return y + b.astype(jnp.float32)


if __name__ == "__main__":
    key = jax.random.PRNGKey(0)
    kx, kw, kb = jax.random.split(key, 3)

    # ViT-ish small shapes: 196 patches + CLS token -> rows = 2*197 = 394
    # (not a tile multiple, exercises row padding); D = 128 keeps the output
    # lane-dense (multiple of 128).
    B, N, D = 2, 197, 128
    x = jax.random.normal(kx, (B, N, D), dtype=jnp.float32)
    w = jax.random.normal(kw, (D, D), dtype=jnp.float32) * 0.02
    b = jax.random.normal(kb, (D,), dtype=jnp.float32) * 0.02

    out = residual_pallas(linear_fn, x, params=(w, b))
    out = jax.block_until_ready(out)

    # Reference (plain JAX) with the same bf16-on-MXU / f32-accumulate numerics.
    y_ref = jnp.dot(
        x.reshape(-1, D).astype(jnp.bfloat16),
        w.astype(jnp.bfloat16),
        preferred_element_type=jnp.float32,
    ).reshape(B, N, D)
    ref = (y_ref + b) + x

    assert out.shape == x.shape and out.dtype == x.dtype
    assert jnp.allclose(out, ref, atol=1e-4, rtol=1e-4), "mismatch vs reference"

    print("KERNEL_OK")
</pallas_src>

<mosaic_0001>
module attributes {stable_mosaic.version = 11 : i64} {
  func.func @_residual_kernel(%arg0: i32, %arg1: memref<256x128xf32, #tpu.memory_space<vmem>>, %arg2: memref<128x128xf32, #tpu.memory_space<vmem>>, %arg3: memref<1x128xf32, #tpu.memory_space<vmem>>, %arg4: memref<256x128xf32, #tpu.memory_space<vmem>>) attributes {dimension_semantics = [#tpu.dimension_semantics<parallel>], iteration_bounds = array<i64: 2>, scalar_prefetch = 0 : i64, scratch_operands = 0 : i64, tpu.core_type = #tpu.core_type<tc>, window_params = [{transform_indices = @transform_0, window_bounds = array<i64: 256, 128>}, {pipeline_mode = #tpu.pipeline_mode<synchronous>, transform_indices = @transform_1, window_bounds = array<i64: 128, 128>}, {pipeline_mode = #tpu.pipeline_mode<synchronous>, transform_indices = @transform_2, window_bounds = array<i64: 1, 128>}, {transform_indices = @transform_3, window_bounds = array<i64: 256, 128>}]} {
    %c0 = arith.constant 0 : index
    %c0_0 = arith.constant 0 : index
    %0 = vector.load %arg1[%c0, %c0_0] : memref<256x128xf32, #tpu.memory_space<vmem>>, vector<256x128xf32>
    %c0_1 = arith.constant 0 : index
    %c0_2 = arith.constant 0 : index
    %1 = vector.load %arg2[%c0_1, %c0_2] : memref<128x128xf32, #tpu.memory_space<vmem>>, vector<128x128xf32>
    %c0_3 = arith.constant 0 : index
    %c0_4 = arith.constant 0 : index
    %2 = vector.load %arg3[%c0_3, %c0_4] : memref<1x128xf32, #tpu.memory_space<vmem>>, vector<1x128xf32>
    %3 = arith.truncf %0 : vector<256x128xf32> to vector<256x128xbf16>
    %4 = arith.truncf %1 : vector<128x128xf32> to vector<128x128xbf16>
    %cst = arith.constant dense<0.000000e+00> : vector<256x128xf32>
    %5 = tpu.matmul %3, %4, %cst {dimension_numbers = #tpu.dot_dimension_numbers<[1], [0], [0], [1], [0, 0, 1, 1], [], []>} : vector<256x128xbf16>, vector<128x128xbf16>, vector<256x128xf32> -> vector<256x128xf32>
    %6 = vector.broadcast %2 : vector<1x128xf32> to vector<256x128xf32>
    %7 = arith.addf %5, %6 : vector<256x128xf32>
    %8 = arith.addf %7, %0 : vector<256x128xf32>
    %c0_5 = arith.constant 0 : index
    %c0_6 = arith.constant 0 : index
    %9 = vector.load %arg4[%c0_5, %c0_6] : memref<256x128xf32, #tpu.memory_space<vmem>>, vector<256x128xf32>
    tpu.vector_store %arg4[%c0_5, %c0_6], %8 {strides = array<i32>} : memref<256x128xf32, #tpu.memory_space<vmem>>, vector<256x128xf32>,
    return
  }
  func.func @transform_0(%arg0: i32) -> (i32, i32) {
    %c0_i32 = arith.constant 0 : i32
    %c0_i32_0 = arith.constant 0 : i32
    return %arg0, %c0_i32 : i32, i32
  }
  func.func @transform_1(%arg0: i32) -> (i32, i32) {
    %c0_i32 = arith.constant 0 : i32
    %c0_i32_0 = arith.constant 0 : i32
    %c0_i32_1 = arith.constant 0 : i32
    return %c0_i32, %c0_i32_0 : i32, i32
  }
  func.func @transform_2(%arg0: i32) -> (i32, i32) {
    %c0_i32 = arith.constant 0 : i32
    %c0_i32_0 = arith.constant 0 : i32
    %c0_i32_1 = arith.constant 0 : i32
    return %c0_i32, %c0_i32_0 : i32, i32
  }
  func.func @transform_3(%arg0: i32) -> (i32, i32) {
    %c0_i32 = arith.constant 0 : i32
    %c0_i32_0 = arith.constant 0 : i32
    return %arg0, %c0_i32 : i32, i32
  }
}

</mosaic_0001>

<bundles_post_ra>
// kernel: tpu_custom_call.1
= control target key start
LH: loop header
LB: loop body
LE: loop exit
PB: predicated region body
PF: predicated region fallthrough
CT: control target
= control target key end

     0   :  { %8 = vsyncpa [#allocation3], 0  ;;  %s1181_s0 = inlined_call_operand.hbm [shape: f32[512,128], index: 0, kind: input, shape index: {}]   ;;  %s1182_s1 = inlined_call_operand.hbm [shape: f32[128,128], index: 1, kind: input, shape index: {}]   ;;  %s1183_s2 = inlined_call_operand.vmem [shape: f32[1,128], index: 2, kind: input, shape index: {}]   ;;  %s1184_s3 = inlined_call_operand.hbm [shape: f32[512,128], index: 3, kind: output, shape index: {}]  }
   0x1   :  { %10 = vsyncpa [#allocation3 + $0x1], 0 }
   0x2   :  { %11 = vsyncpa [#allocation6], 0 }
   0x3   :  { %12 = vsyncpa [#allocation4], 0 }
   0x4   :  { %14 = vsyncpa [#allocation4 + $0x1], 0  ;;  %s799_s12 = smov 0   ;;  %s801_s13 = smov 0  }
   0x5   :  { %s803_s14 = smov 0   ;;  %s805_s15 = smov 0  }
   0x6 LB: > { %s820_s16 = sadd.s32 4294967295, %s772_s15   ;;  %s538_s17 = sadd.s32 4294967294, %s772_s15   ;;  %s772_s15 = sphi %s805_s15, %s1194_s15   ;;  %s768_s14 = sphi %s803_s14, %s1193_s14   ;;  %s764_s13 = sphi %s801_s13, %s1192_s13   ;;  %s760_s12 = sphi %s799_s12, %s1191_s12  }
   0x7   : > { %p40_p0 = scmp.ne.s32.totalorder %s764_s13, %s760_s12  ;;  %p41_p1 = scmp.eq.s32.totalorder %s820_s16, 0 }
   0x8   : > { %p106_p2 = scmp.eq.s32.totalorder %s820_s16, 1  ;;  %p112_p3 = scmp.eq.s32.totalorder %s538_s17, 1 }
   0x9   : > { %p829_p4 = por %p41_p1, %p40_p0  ;;  %p539_p5 = scmp.ge.s32.totalorder %s772_s15, 1 }
   0xa   : > { %p834_p6 = por %p112_p3, %p40_p0  ;;  %p119_p7 = scmp.lt.s32.totalorder %s772_s15, 3 }
   0xb   : > { %s130_s22 = sshll.u32 %s1182_s1, 4  ;;  %s774_s24 = smov [#allocation5]   ;;  %s131_s22 = int_to_ptr.hbm [resolvable:$true] %s130_s22 }
   0xc   : > { %p842_p8 = pnand %p539_p5, %p119_p7  ;;  %s132_s25 = sshll.u32 %s774_s24, 4  ;;  %s133_s25 = int_to_ptr.vmem [resolvable:$true] %s132_s25 }
   0xd   : > { %s852_s26 = sadd.s32 1, %s772_s15   ;;  %s775_s27 = smov 128  }
   0xe   : > { %p588_p9 = pneg %p842_p8  ;;  %s776_s28 = smov 8  }
   0xf   : > { %s24_s29 = ssub.s32 %s772_s15, %s852_s26  ;;  %s27_s30 = sadd.s32 1, %s768_s14 }
  0x10   : > { %p589_p10 = pnand %p588_p9, %p41_p1  ;;  %p25_p12 = scmp.eq.s32.totalorder %s24_s29, 0 }
  0x11   : > { %p34_p13 = scmp.ne.s32.totalorder %s768_s14, %s764_s13  ;;  %p35_p0 = scmp.eq.s32.totalorder %s772_s15, 0 }
  0x12   : > { %591 = dma.hbm_to_vmem [thread:$0]  (!%p589_p10), %s131_s22, 2048, %s133_s25, [#allocation6], %s775_s27, %s775_s27, %s776_s28  }
  0x13   : > { %s864_s4 = scalar_select %p25_p12, %s768_s14, %s27_s30  }
  0x14   : > { %p868_p3 = por %p106_p2, %p34_p13  ;;  %p601_p5 = scmp.lt.s32.totalorder %s772_s15, 2 }
  0x15   : > { %s149_s6 = sand.u32 1, %s768_s14   ;;  %s554_s7 = sshll.u32 %s772_s15, 8 }
  0x16   : > { %p36_p7 = por %p35_p0, %p34_p13  ;;  %s542_s8 = sshll.u32 %s149_s6, 8 }
  0x17   : > { %s158_s11 = scalar_lea.hbm %s1181_s0, %s554_s7  ;;  %s153_s20 = scalar_lea.vmem [#allocation2], %s542_s8 }
  0x18   : > { %s159_s17 = sshll.u32 %s158_s11, 4  ;;  %s161_s21 = sshll.u32 %s153_s20, 4  ;;  %s160_s17 = int_to_ptr.hbm [resolvable:$true] %s159_s17  ;;  %s162_s21 = int_to_ptr.vmem [resolvable:$true] %s161_s21 }
  0x19   : > { %p878_p9 = pnand %p601_p5, %p36_p7  ;;  %s150_s24 = scalar_lea.sflag [#allocation3], %s149_s6 }
  0x1a   : > { %s672_s25 = sshra.s32 %s160_s17, 4  ;;  %s679_s8 = scalar_lea.hbm %s1181_s0, 512  ;;  %s673_s25 = int_to_ptr.hbm [resolvable:$true] %s672_s25 }
  0x1b   : > { %s674_s29 = scalar_lea.hbm %s673_s25, 256  ;;  %p676_p10 = pneg %p878_p9 }
  0x1c   : > { %p675_p2 = scmp.ne.s32.totalorder %s673_s25, %s674_s29  ;;  %p680_p0 = scmp.lt.s32.totalorder %s673_s25, %s1181_s0 }
  0x1d   : > { %p681_p5 = scmp.lt.s32.totalorder %s679_s8, %s674_s29 }
  0x1e   : > { %p677_p12 = pnand %p676_p10, %p675_p2 }
  0x1f   : > { %p682_p7 = por %p681_p5, %p680_p0 }
  0x20   : > { %p678_p13 = pneg %p677_p12 }
  0x22   : > { %p683_p11 = pnand %p682_p7, %p678_p13 }
  0x24   : > { %686 = shalt.err (!%p683_p11)
}
  0x25   : > { %595 = dma.hbm_to_vmem [thread:$0]  (!%p878_p9), %s160_s17, 4096, %s162_s21, %s150_s24, %s775_s27, %s775_s27, %s776_s28  }
  0x26   : > { %173 = sbr.rel (%p842_p8) target bundleno = 278 (0x116), region = 32  ;;  %s898_s6 = sand.u32 (!%p842_p8), 1, %s764_s13  }
  0x27   : > { %s546_s11 = sshll.u32 (!%p842_p8), %s898_s6, 8  ;;  %s176_s20 = scalar_lea.sflag (!%p842_p8), [#allocation3], %s898_s6 }
  0x28   : > { %s904_s25 = scalar_lea.vmem (!%p842_p8), [#allocation2], %s546_s11 }
  0x2b   : > { %747 = dma.done.wait (%p829_p4), %s176_s20, 4096  }
  0x2c   : > { %749 = vsyncadd (%p829_p4), %s176_s20, 4294963200 }
  0x2d   : > { %751 = dma.done.wait (%p41_p1), [#allocation6], 2048  }
  0x2e   : > { %753 = vsyncadd (%p41_p1), [#allocation6], 4294965248  ;;  %v256_v0 = vld [vmem:[#allocation5 + $0x70] sm:$0xff]  ;;  %v257_v1 = vld [vmem:[#allocation5 + $0x78] sm:$0xff]  ;;  %s1053_s27 = scalar_lea.vmem [#allocation7], %s546_s11  ;;  %s555_s28 = sshll.u32 %s820_s16, 8 }
  0x2f   : > { %v254_v2 = vld [vmem:[#allocation5 + $0x60] sm:$0xff]  ;;  %v282_v3 = vpack.c.bf16 %v257_v1, %v256_v0  ;;  %v255_v4 = vld [vmem:[#allocation5 + $0x68] sm:$0xff]  ;;  %v252_v6 = vld [vmem:[#allocation5 + $0x50] sm:$0xff]  ;;  %s451_s22 = scalar_lea.hbm %s1184_s3, %s555_s28  ;;  %s452_s16 = sshll.u32 %s1053_s27, 4  ;;  %s453_s16 = int_to_ptr.vmem [resolvable:$true] %s452_s16 }
  0x30   : > { %v281_v5 = vpack.c.bf16 %v255_v4, %v254_v2  ;;  %v253_v7 = vld [vmem:[#allocation5 + $0x58] sm:$0xff]  ;;  %v250_v9 = vld [vmem:[#allocation5 + $0x40] sm:$0xff]  ;;  %v251_v10 = vld [vmem:[#allocation5 + $0x48] sm:$0xff]  ;;  %s454_s24 = sshll.u32 %s451_s22, 4  ;;  %s440_s29 = scalar_lea.sflag [#allocation4], %s898_s6  ;;  %s455_s24 = int_to_ptr.hbm [resolvable:$true] %s454_s24 }
  0x31   : > { %286 = vmatpush.bf16.msra.mxu0 %v282_v3  ;;  %556 = vmatpush.bf16.msra.mxu1 %v282_v3  ;;  %v280_v8 = vpack.c.bf16 %v253_v7, %v252_v6  ;;  %v279_v11 = vpack.c.bf16 %v251_v10, %v250_v9  ;;  %v248_v12 = vld [vmem:[#allocation5 + $0x30] sm:$0xff]  ;;  %v249_v13 = vld [vmem:[#allocation5 + $0x38] sm:$0xff]  ;;  %v246_v15 = vld [vmem:[#allocation5 + $0x20] sm:$0xff]  ;;  %s716_s30 = sshra.s32 %s455_s24, 4  ;;  %s722_s10 = scalar_lea.hbm %s1184_s3, 512  ;;  %s717_s30 = int_to_ptr.hbm [resolvable:$true] %s716_s30 }
  0x32   : > { %557 = vmatpush.bf16.msra.mxu2 %v282_v3  ;;  %558 = vmatpush.bf16.msra.mxu3 %v282_v3  ;;  %v278_v14 = vpack.c.bf16 %v249_v13, %v248_v12  ;;  %v247_v16 = vld [vmem:[#allocation5 + $0x28] sm:$0xff]  ;;  %v244_v18 = vld [vmem:[#allocation5 + $0x10] sm:$0xff]  ;;  %v245_v19 = vld [vmem:[#allocation5 + $0x18] sm:$0xff]  ;;  %s718_s7 = scalar_lea.hbm %s717_s30, 256  ;;  %p723_p11 = scmp.lt.s32.totalorder %s717_s30, %s1184_s3 }
  0x33   : > { %v277_v17 = vpack.c.bf16 %v247_v16, %v246_v15  ;;  %v276_v20 = vpack.c.bf16 %v245_v19, %v244_v18  ;;  %v242_v21 = vld [vmem:[#allocation5] sm:$0xff]  ;;  %v243_v22 = vld [vmem:[#allocation5 + $0x8] sm:$0xff]  ;;  %v947_v36 = vld [vmem:[%s904_s25 + $0x10] sm:$0xff]  ;;  %p719_p1 = scmp.ne.s32.totalorder %s717_s30, %s718_s7  ;;  %p724_p9 = scmp.lt.s32.totalorder %s722_s10, %s718_s7 }
  0x34   : > { %v915_v23 = vld [vmem:[%s904_s25] sm:$0xff]  ;;  %v918_v24 = vld [vmem:[%s904_s25 + $0x8] sm:$0xff]  ;;  %v275_v25 = vpack.c.bf16 %v243_v22, %v242_v21  ;;  %v950_v37 = vld [vmem:[%s904_s25 + $0x18] sm:$0xff] }
  0x35   : > { %287 = vmatpush.bf16.msra.mxu0 %v281_v5  ;;  %559 = vmatpush.bf16.msra.mxu1 %v281_v5  ;;  %v921_v26 = vld [vmem:[%s904_s25 + $0x40] sm:$0xff]  ;;  %v924_v27 = vld [vmem:[%s904_s25 + $0x48] sm:$0xff]  ;;  %v259_v32 = vpack.c.bf16 %v918_v24, %v915_v23  ;;  %v953_v38 = vld [vmem:[%s904_s25 + $0x50] sm:$0xff]  ;;  %v260_v44 = vpack.c.bf16 %v950_v37, %v947_v36  ;;  %p720_p4 = pnand %p719_p1, %p868_p3  ;;  %p725_p2 = por %p724_p9, %p723_p11 }
  0x36   : > { %560 = vmatpush.bf16.msra.mxu2 %v281_v5  ;;  %561 = vmatpush.bf16.msra.mxu3 %v281_v5  ;;  %v927_v28 = vld [vmem:[%s904_s25 + $0x80] sm:$0xff]  ;;  %v930_v29 = vld [vmem:[%s904_s25 + $0x88] sm:$0xff]  ;;  %v263_v33 = vpack.c.bf16 %v924_v27, %v921_v26  ;;  %v956_v39 = vld [vmem:[%s904_s25 + $0x58] sm:$0xff] }
  0x37   : > { %v933_v30 = vld [vmem:[%s904_s25 + $0xc0] sm:$0xff]  ;;  %v936_v31 = vld [vmem:[%s904_s25 + $0xc8] sm:$0xff]  ;;  %v267_v34 = vpack.c.bf16 %v930_v29, %v927_v28  ;;  %v959_v40 = vld [vmem:[%s904_s25 + $0x90] sm:$0xff]  ;;  %v264_v45 = vpack.c.bf16 %v956_v39, %v953_v38  ;;  %p721_p8 = pneg %p720_p4 }
  0x38   : > { %v271_v35 = vpack.c.bf16 %v936_v31, %v933_v30  ;;  %v962_v41 = vld [vmem:[%s904_s25 + $0x98] sm:$0xff]  ;;  %v965_v42 = vld [vmem:[%s904_s25 + $0xd0] sm:$0xff]  ;;  %v979_v48 = vld [vmem:[%s904_s25 + $0x20] sm:$0xff] }
  0x39   : > { %288 = vmatpush.bf16.msra.mxu0 %v280_v8  ;;  %562 = vmatpush.bf16.msra.mxu1 %v280_v8  ;;  %v968_v43 = vld [vmem:[%s904_s25 + $0xd8] sm:$0xff]  ;;  %v268_v46 = vpack.c.bf16 %v962_v41, %v959_v40  ;;  %v982_v49 = vld [vmem:[%s904_s25 + $0x28] sm:$0xff]  ;;  %v985_v50 = vld [vmem:[%s904_s25 + $0x60] sm:$0xff]  ;;  %p726_p10 = pnand %p725_p2, %p721_p8 }
  0x3a   : > { %563 = vmatpush.bf16.msra.mxu2 %v280_v8  ;;  %564 = vmatpush.bf16.msra.mxu3 %v280_v8  ;;  %v272_v47 = vpack.c.bf16 %v968_v43, %v965_v42  ;;  %v988_v51 = vld [vmem:[%s904_s25 + $0x68] sm:$0xff]  ;;  %v991_v52 = vld [vmem:[%s904_s25 + $0xa0] sm:$0xff]  ;;  %v261_v56 = vpack.c.bf16 %v982_v49, %v979_v48  ;;  %v1011_v60 = vld [vmem:[%s904_s25 + $0x30] sm:$0xff] }
  0x3b   : > { %v994_v53 = vld [vmem:[%s904_s25 + $0xa8] sm:$0xff]  ;;  %v997_v54 = vld [vmem:[%s904_s25 + $0xe0] sm:$0xff]  ;;  %v265_v57 = vpack.c.bf16 %v988_v51, %v985_v50  ;;  %v1014_v61 = vld [vmem:[%s904_s25 + $0x38] sm:$0xff] }
  0x3c   : > { %v1000_v55 = vld [vmem:[%s904_s25 + $0xe8] sm:$0xff]  ;;  %v269_v58 = vpack.c.bf16 %v994_v53, %v991_v52  ;;  %v1017_v62 = vld [vmem:[%s904_s25 + $0x70] sm:$0xff]  ;;  %v1020_v63 = vld [vmem:[%s904_s25 + $0x78] sm:$0xff]  ;;  %v262_v4 = vpack.c.bf16 %v1014_v61, %v1011_v60 }
  0x3d   : > { %289 = vmatpush.bf16.msra.mxu0 %v279_v11  ;;  %565 = vmatpush.bf16.msra.mxu1 %v279_v11  ;;  %v273_v59 = vpack.c.bf16 %v1000_v55, %v997_v54  ;;  %v1023_v0 = vld [vmem:[%s904_s25 + $0xb0] sm:$0xff]  ;;  %v1026_v1 = vld [vmem:[%s904_s25 + $0xb8] sm:$0xff]  ;;  %v266_v5 = vpack.c.bf16 %v1020_v63, %v1017_v62  ;;  %v1045_v8 = vld [vmem:[%s1183_s2] ss:$0 sm:$0xff] }
  0x3e   : > { %566 = vmatpush.bf16.msra.mxu2 %v279_v11  ;;  %567 = vmatpush.bf16.msra.mxu3 %v279_v11  ;;  %v1029_v2 = vld [vmem:[%s904_s25 + $0xf0] sm:$0xff]  ;;  %v1032_v3 = vld [vmem:[%s904_s25 + $0xf8] sm:$0xff]  ;;  %v270_v6 = vpack.c.bf16 %v1026_v1, %v1023_v0 }
  0x3f   : > { %v274_v7 = vpack.c.bf16 %v1032_v3, %v1029_v2 }
  0x41   : > { %290 = vmatpush.bf16.msra.mxu0 %v278_v14  ;;  %568 = vmatpush.bf16.msra.mxu1 %v278_v14 }
  0x42   : > { %569 = vmatpush.bf16.msra.mxu2 %v278_v14  ;;  %570 = vmatpush.bf16.msra.mxu3 %v278_v14 }
  0x45   : > { %291 = vmatpush.bf16.msra.mxu0 %v277_v17  ;;  %571 = vmatpush.bf16.msra.mxu1 %v277_v17 }
  0x46   : > { %572 = vmatpush.bf16.msra.mxu2 %v277_v17  ;;  %573 = vmatpush.bf16.msra.mxu3 %v277_v17 }
  0x49   : > { %292 = vmatpush.bf16.msra.mxu0 %v276_v20  ;;  %574 = vmatpush.bf16.msra.mxu1 %v276_v20 }
  0x4a   : > { %575 = vmatpush.bf16.msra.mxu2 %v276_v20  ;;  %576 = vmatpush.bf16.msra.mxu3 %v276_v20 }
  0x4d   : > { %293 = vmatpush.bf16.msra.mxu0 %v275_v25  ;;  %577 = vmatpush.bf16.msra.mxu1 %v275_v25 }
  0x4e   : > { %578 = vmatpush.bf16.msra.mxu2 %v275_v25  ;;  %579 = vmatpush.bf16.msra.mxu3 %v275_v25 }
  0x50   : > { %294 = vmatmul.bf16.vlgmr.msra.gmra.mxu0 %v259_v32  ;;  %314 = vmatmul.bf16.vlgmr.msra.gmra.mxu1 %v263_v33 }
  0x51   : > { %334 = vmatmul.bf16.vlgmr.msra.gmra.mxu2 %v267_v34  ;;  %354 = vmatmul.bf16.vlgmr.msra.gmra.mxu3 %v271_v35 }
  0x60   : > { %299 = vmatmul.bf16.gmra.mxu0 %v260_v44  ;;  %319 = vmatmul.bf16.gmra.mxu1 %v264_v45 }
  0x61   : > { %339 = vmatmul.bf16.gmra.mxu2 %v268_v46  ;;  %359 = vmatmul.bf16.gmra.mxu3 %v272_v47 }
  0x70   : > { %304 = vmatmul.bf16.gmra.mxu0 %v261_v56  ;;  %324 = vmatmul.bf16.gmra.mxu1 %v265_v57 }
  0x71   : > { %344 = vmatmul.bf16.gmra.mxu2 %v269_v58  ;;  %364 = vmatmul.bf16.gmra.mxu3 %v273_v59 }
  0x80   : > { %309 = vmatmul.bf16.gmra.mxu0 %v262_v4  ;;  %329 = vmatmul.bf16.gmra.mxu1 %v266_v5 }
  0x81   : > { %349 = vmatmul.bf16.gmra.mxu2 %v270_v6  ;;  %369 = vmatmul.bf16.gmra.mxu3 %v274_v7 }
  0xcd   : > { %v295_v9 = vpop.f32.mrf.mxu0  ;;  %v315_v10 = vpop.f32.mrf.mxu1 }
  0xce   : > { %v296_v11 = vadd.f32 %v1045_v8, %v295_v9  ;;  %v316_v12 = vadd.f32 %v1045_v8, %v315_v10 }
  0xd0   : > { %v375_v13 = vadd.f32 %v296_v11, %v915_v23  ;;  %v383_v14 = vadd.f32 %v316_v12, %v921_v26 }
  0xd2   : > { %407 = vst [vmem:[%s1053_s27] sm:$0xff] %v375_v13 }
  0xd3   : > { %415 = vst [vmem:[%s1053_s27 + $0x40] sm:$0xff] %v383_v14 }
  0xd4   : > { %v335_v15 = vpop.f32.mrf.mxu2  ;;  %v355_v16 = vpop.f32.mrf.mxu3 }
  0xd5   : > { %v336_v17 = vadd.f32 %v1045_v8, %v335_v15  ;;  %v356_v18 = vadd.f32 %v1045_v8, %v355_v16  ;;  %v297_v19 = vpop.f32.mrf.mxu0  ;;  %v317_v20 = vpop.f32.mrf.mxu1 }
  0xd6   : > { %v298_v21 = vadd.f32 %v1045_v8, %v297_v19  ;;  %v318_v22 = vadd.f32 %v1045_v8, %v317_v20 }
  0xd7   : > { %v391_v23 = vadd.f32 %v336_v17, %v927_v28  ;;  %v399_v25 = vadd.f32 %v356_v18, %v933_v30 }
  0xd8   : > { %v376_v26 = vadd.f32 %v298_v21, %v918_v24  ;;  %v384_v32 = vadd.f32 %v318_v22, %v924_v27 }
  0xd9   : > { %423 = vst [vmem:[%s1053_s27 + $0x80] sm:$0xff] %v391_v23 }
  0xda   : > { %431 = vst [vmem:[%s1053_s27 + $0xc0] sm:$0xff] %v399_v25 }
  0xdb   : > { %408 = vst [vmem:[%s1053_s27 + $0x8] sm:$0xff] %v376_v26 }
  0xdc   : > { %416 = vst [vmem:[%s1053_s27 + $0x48] sm:$0xff] %v384_v32  ;;  %v337_v33 = vpop.f32.mrf.mxu2  ;;  %v357_v34 = vpop.f32.mrf.mxu3 }
  0xdd   : > { %v338_v35 = vadd.f32 %v1045_v8, %v337_v33  ;;  %v358_v28 = vadd.f32 %v1045_v8, %v357_v34  ;;  %v300_v44 = vpop.f32.mrf.mxu0  ;;  %v320_v30 = vpop.f32.mrf.mxu1 }
  0xde   : > { %v301_v24 = vadd.f32 %v1045_v8, %v300_v44  ;;  %v321_v27 = vadd.f32 %v1045_v8, %v320_v30 }
  0xdf   : > { %v392_v45 = vadd.f32 %v338_v35, %v930_v29  ;;  %v400_v46 = vadd.f32 %v358_v28, %v936_v31 }
  0xe0   : > { %v377_v47 = vadd.f32 %v301_v24, %v947_v36  ;;  %v385_v56 = vadd.f32 %v321_v27, %v953_v38 }
  0xe1   : > { %424 = vst [vmem:[%s1053_s27 + $0x88] sm:$0xff] %v392_v45 }
  0xe2   : > { %432 = vst [vmem:[%s1053_s27 + $0xc8] sm:$0xff] %v400_v46 }
  0xe3   : > { %409 = vst [vmem:[%s1053_s27 + $0x10] sm:$0xff] %v377_v47 }
  0xe4   : > { %417 = vst [vmem:[%s1053_s27 + $0x50] sm:$0xff] %v385_v56  ;;  %v340_v57 = vpop.f32.mrf.mxu2  ;;  %v360_v58 = vpop.f32.mrf.mxu3 }
  0xe5   : > { %v341_v59 = vadd.f32 %v1045_v8, %v340_v57  ;;  %v361_v29 = vadd.f32 %v1045_v8, %v360_v58  ;;  %v302_v4 = vpop.f32.mrf.mxu0  ;;  %v322_v31 = vpop.f32.mrf.mxu1 }
  0xe6   : > { %v303_v36 = vadd.f32 %v1045_v8, %v302_v4  ;;  %v323_v38 = vadd.f32 %v1045_v8, %v322_v31 }
  0xe7   : > { %v393_v5 = vadd.f32 %v341_v59, %v959_v40  ;;  %v401_v6 = vadd.f32 %v361_v29, %v965_v42 }
  0xe8   : > { %v378_v7 = vadd.f32 %v303_v36, %v950_v37  ;;  %v386_v9 = vadd.f32 %v323_v38, %v956_v39 }
  0xe9   : > { %425 = vst [vmem:[%s1053_s27 + $0x90] sm:$0xff] %v393_v5 }
  0xea   : > { %433 = vst [vmem:[%s1053_s27 + $0xd0] sm:$0xff] %v401_v6 }
  0xeb   : > { %410 = vst [vmem:[%s1053_s27 + $0x18] sm:$0xff] %v378_v7 }
  0xec   : > { %418 = vst [vmem:[%s1053_s27 + $0x58] sm:$0xff] %v386_v9  ;;  %v342_v10 = vpop.f32.mrf.mxu2  ;;  %v362_v11 = vpop.f32.mrf.mxu3 }
  0xed   : > { %v343_v12 = vadd.f32 %v1045_v8, %v342_v10  ;;  %v363_v40 = vadd.f32 %v1045_v8, %v362_v11  ;;  %v305_v13 = vpop.f32.mrf.mxu0  ;;  %v325_v42 = vpop.f32.mrf.mxu1 }
  0xee   : > { %v306_v37 = vadd.f32 %v1045_v8, %v305_v13  ;;  %v326_v39 = vadd.f32 %v1045_v8, %v325_v42 }
  0xef   : > { %v394_v14 = vadd.f32 %v343_v12, %v962_v41  ;;  %v402_v15 = vadd.f32 %v363_v40, %v968_v43 }
  0xf0   : > { %v379_v16 = vadd.f32 %v306_v37, %v979_v48  ;;  %v387_v17 = vadd.f32 %v326_v39, %v985_v50 }
  0xf1   : > { %426 = vst [vmem:[%s1053_s27 + $0x98] sm:$0xff] %v394_v14 }
  0xf2   : > { %434 = vst [vmem:[%s1053_s27 + $0xd8] sm:$0xff] %v402_v15 }
  0xf3   : > { %411 = vst [vmem:[%s1053_s27 + $0x20] sm:$0xff] %v379_v16 }
  0xf4   : > { %419 = vst [vmem:[%s1053_s27 + $0x60] sm:$0xff] %v387_v17  ;;  %v345_v18 = vpop.f32.mrf.mxu2  ;;  %v365_v19 = vpop.f32.mrf.mxu3 }
  0xf5   : > { %v346_v20 = vadd.f32 %v1045_v8, %v345_v18  ;;  %v366_v41 = vadd.f32 %v1045_v8, %v365_v19  ;;  %v307_v21 = vpop.f32.mrf.mxu0  ;;  %v327_v43 = vpop.f32.mrf.mxu1 }
  0xf6   : > { %v308_v48 = vadd.f32 %v1045_v8, %v307_v21  ;;  %v328_v50 = vadd.f32 %v1045_v8, %v327_v43 }
  0xf7   : > { %v395_v22 = vadd.f32 %v346_v20, %v991_v52  ;;  %v403_v23 = vadd.f32 %v366_v41, %v997_v54 }
  0xf8   : > { %v380_v25 = vadd.f32 %v308_v48, %v982_v49  ;;  %v388_v26 = vadd.f32 %v328_v50, %v988_v51 }
  0xf9   : > { %427 = vst [vmem:[%s1053_s27 + $0xa0] sm:$0xff] %v395_v22 }
  0xfa   : > { %435 = vst [vmem:[%s1053_s27 + $0xe0] sm:$0xff] %v403_v23 }
  0xfb   : > { %412 = vst [vmem:[%s1053_s27 + $0x28] sm:$0xff] %v380_v25 }
  0xfc   : > { %420 = vst [vmem:[%s1053_s27 + $0x68] sm:$0xff] %v388_v26  ;;  %v347_v32 = vpop.f32.mrf.mxu2  ;;  %v367_v33 = vpop.f32.mrf.mxu3 }
  0xfd   : > { %v348_v34 = vadd.f32 %v1045_v8, %v347_v32  ;;  %v368_v52 = vadd.f32 %v1045_v8, %v367_v33  ;;  %v310_v35 = vpop.f32.mrf.mxu0  ;;  %v330_v54 = vpop.f32.mrf.mxu1 }
  0xfe   : > { %v311_v49 = vadd.f32 %v1045_v8, %v310_v35  ;;  %v331_v51 = vadd.f32 %v1045_v8, %v330_v54 }
  0xff   : > { %v396_v28 = vadd.f32 %v348_v34, %v994_v53  ;;  %v404_v44 = vadd.f32 %v368_v52, %v1000_v55 }
 0x100   : > { %v381_v30 = vadd.f32 %v311_v49, %v1011_v60  ;;  %v389_v24 = vadd.f32 %v331_v51, %v1017_v62 }
 0x101   : > { %428 = vst [vmem:[%s1053_s27 + $0xa8] sm:$0xff] %v396_v28 }
 0x102   : > { %436 = vst [vmem:[%s1053_s27 + $0xe8] sm:$0xff] %v404_v44 }
 0x103   : > { %413 = vst [vmem:[%s1053_s27 + $0x30] sm:$0xff] %v381_v30 }
 0x104   : > { %421 = vst [vmem:[%s1053_s27 + $0x70] sm:$0xff] %v389_v24  ;;  %v350_v27 = vpop.f32.mrf.mxu2  ;;  %v370_v45 = vpop.f32.mrf.mxu3 }
 0x105   : > { %v351_v46 = vadd.f32 %v1045_v8, %v350_v27  ;;  %v371_v53 = vadd.f32 %v1045_v8, %v370_v45  ;;  %v312_v47 = vpop.f32.mrf.mxu0  ;;  %v332_v55 = vpop.f32.mrf.mxu1 }
 0x106   : > { %v313_v60 = vadd.f32 %v1045_v8, %v312_v47  ;;  %v333_v62 = vadd.f32 %v1045_v8, %v332_v55 }
 0x107   : > { %v397_v56 = vadd.f32 %v351_v46, %v1023_v0  ;;  %v405_v57 = vadd.f32 %v371_v53, %v1029_v2 }
 0x108   : > { %v382_v58 = vadd.f32 %v313_v60, %v1014_v61  ;;  %v390_v59 = vadd.f32 %v333_v62, %v1020_v63 }
 0x109   : > { %429 = vst [vmem:[%s1053_s27 + $0xb0] sm:$0xff] %v397_v56 }
 0x10a   : > { %437 = vst [vmem:[%s1053_s27 + $0xf0] sm:$0xff] %v405_v57 }
 0x10b   : > { %414 = vst [vmem:[%s1053_s27 + $0x38] sm:$0xff] %v382_v58 }
 0x10c   : > { %422 = vst [vmem:[%s1053_s27 + $0x78] sm:$0xff] %v390_v59  ;;  %v352_v29 = vpop.f32.mrf.mxu2  ;;  %v372_v4 = vpop.f32.mrf.mxu3 }
 0x10d   : > { %v353_v61 = vadd.f32 %v1045_v8, %v352_v29  ;;  %v373_v63 = vadd.f32 %v1045_v8, %v372_v4 }
 0x10f   : > { %v398_v0 = vadd.f32 %v353_v61, %v1026_v1  ;;  %v406_v2 = vadd.f32 %v373_v63, %v1032_v3 }
 0x111   : > { %430 = vst [vmem:[%s1053_s27 + $0xb8] sm:$0xff] %v398_v0 }
 0x112   : > { %438 = vst [vmem:[%s1053_s27 + $0xf8] sm:$0xff] %v406_v2 }
 0x113   : > { %729 = shalt.err (!%p726_p10)
}
 0x114   : > { %s777_s6 = smov 128   ;;  %s778_s25 = smov 8  }
 0x115   : > { %586 = dma.vmem_to_hbm [thread:$0]  (%p868_p3), %s453_s16, 4096, %s455_s24, %s440_s29, %s777_s6, %s777_s6, %s778_s25  }
 0x116 PF: > { %s469_s18 = sand.u32 1, %s760_s12   ;;  %p1190_p12 = scmp.ge.s32.totalorder %s772_s15, 2 }
 0x117   : > { %s470_s23 = scalar_lea.sflag [#allocation4], %s469_s18 }
 0x118   : > { %p597_p13 = pnand %p1190_p12, %p834_p6 }
 0x11a   : > { %p598_p0 = pneg %p597_p13 }
 0x11c   : > { %755 = dma.done.wait (%p598_p0), %s470_s23, 4096  }
 0x11d   : > { %757 = vsyncadd (%p598_p0), %s470_s23, 4294963200  ;;  %p17_p5 = scmp.ge.s32.totalorder %s852_s26, 4   ;;  %s1191_s12 = smov %s764_s13 }
 0x11e   : > { %s1192_s13 = smov %s768_s14  ;;  %s1193_s14 = smov %s864_s4 }
 0x11f   : > { %s1194_s15 = smov %s852_s26  ;;  %19 = sbr.rel (!%p17_p5) target bundleno = 6 (0x6), region = 81 }
 0x124   :  { %476 = vsyncpa [#allocation3], 1 }
 0x125   :  { %478 = vsyncpa [#allocation3 + $0x1], 1 }
 0x126   :  { %479 = vsyncpa [#allocation6], 1 }
 0x127   :  { %480 = vsyncpa [#allocation4], 1 }
 0x128   :  { %482 = vsyncpa [#allocation4 + $0x1], 1 }

</bundles_post_ra>
